<compile_context>
chip_gen: v7x
topology: tpu7x:2x2x1
jax: 0.10.0
libtpu: 0.0.40
codegen_flags: <defaults>
</compile_context>

<pallas_src>
import functools

import jax
import jax.numpy as jnp
from jax import lax
from jax.experimental import pallas as pl
from jax.experimental.pallas import tpu as pltpu

_INNER_CHUNK = 512  # lanes processed fully in vregs per inner loop iteration


def _round_up(n, m):
    return ((n + m - 1) // m) * m


def _choose_tile(batch, block_b):
    """Batch-tile (lane) size: multiple of 128, aims for >=4 grid steps when the
    batch is large (megacore sharding + pipeline priming), capped at 16384 so
    the double-buffered I/O fits the default scoped-VMEM limit everywhere."""
    tb = max(1, -(-batch // 4))              # ~cdiv(batch, 4)
    tb = min(tb, block_b, 16384)
    tb = _round_up(tb, 128)
    if tb > _INNER_CHUNK:
        tb = _round_up(tb, _INNER_CHUNK)     # inner sub-chunking divides evenly
    return tb


def gaussnet_kernel(xt_ref, w1_ref, b1_ref, w2_ref, w3_ref, out_ref):
    # Tiny (<10 KiB) augmented weights; constant index_maps keep them
    # VMEM-resident across grid steps.
    w1 = w1_ref[...]            # (33, 8)  rows 0..31 = affine1.weight, row 32 = 0
    b1 = b1_ref[...]            # (33, 1)  rows 0..31 = affine1.bias,   row 32 = 1
    w2 = w2_ref[...]            # (33, 33) [[linear.weight, linear.bias], [0, 1]]
    w3 = w3_ref[...]            # (2, 33)  [affine2.weight | affine2.bias]

    tb = xt_ref.shape[1]
    cs = min(_INNER_CHUNK, tb)
    n_chunks = tb // cs         # tb is constructed to be a multiple of cs

    def body(c, carry):
        off = pl.multiple_of(c * cs, 128)
        xt = xt_ref[:, pl.ds(off, cs)]                                  # (8, cs)
        # affine1 + relu on the MXU; row 32 of h1 is the constant-1 lane that
        # carries the biases of the next two layers through the MXU.
        h1 = jnp.maximum(
            jnp.dot(w1, xt, preferred_element_type=jnp.float32) + b1, 0.0)   # (33, cs)
        # linear (+ bias folded into the contraction) + relu.
        h2 = jnp.maximum(
            jnp.dot(w2, h1, preferred_element_type=jnp.float32), 0.0)        # (33, cs)
        # affine2 (+ bias folded) -> mu.  Final relu in the reference is dead code.
        mu = jnp.dot(w3, h2, preferred_element_type=jnp.float32)             # (2, cs)
        out_ref[:, pl.ds(off, cs)] = mu.astype(out_ref.dtype)
        return carry

    lax.fori_loop(0, n_chunks, body, 0, unroll=True)


def _pack_params(p):
    """Augment torch-layout params for the bias-folding trick."""
    f32 = jnp.float32
    w1f = jnp.concatenate([p["w1"].astype(f32), jnp.zeros((1, 8), f32)], axis=0)   # (33, 8)
    b1f = jnp.concatenate([p["b1"].astype(f32), jnp.ones((1, 1), f32)], axis=0)    # (33, 1)
    w2_top = jnp.concatenate([p["w2"].astype(f32), p["b2"].astype(f32)], axis=1)   # (32, 33)
    w2_bot = jnp.concatenate([jnp.zeros((1, 32), f32), jnp.ones((1, 1), f32)], axis=1)
    w2f = jnp.concatenate([w2_top, w2_bot], axis=0)                                # (33, 33)
    w3f = jnp.concatenate([p["w3"].astype(f32), p["b3"].astype(f32)], axis=1)      # (2, 33)
    return w1f, b1f, w2f, w3f


@functools.partial(jax.jit, static_argnames=("block_b",))
def gaussnet_forward(x, params, block_b=8192):
    """x: (B, 8) float32.  params: torch layout w (out, in), b (out, 1).

    Returns mu of shape (B, 2).
    """
    B = x.shape[0]
    tb = _choose_tile(B, block_b)
    grid = (pl.cdiv(B, tb),)               # ragged trailing block handled by Pallas

    # Batch on the lane axis.  (Callers that can feed feature-major (8, B) and
    # consume (2, B) directly can drop both of these relayout passes.)
    xt = jnp.transpose(x).astype(jnp.float32)            # (8, B)
    w1f, b1f, w2f, w3f = _pack_params(params)

    batch_tile = lambda i: (0, i)    # moves along the batch/lane axis
    resident = lambda i: (0, 0)      # weights stay put in VMEM

    out_t = pl.pallas_call(
        gaussnet_kernel,
        out_shape=jax.ShapeDtypeStruct((2, B), jnp.float32),
        grid_spec=pltpu.PrefetchScalarGridSpec(
            num_scalar_prefetch=0,
            grid=grid,
            in_specs=[
                pl.BlockSpec((8, tb), batch_tile),    # x^T tile
                pl.BlockSpec((33, 8), resident),      # augmented w1
                pl.BlockSpec((33, 1), resident),      # augmented b1
                pl.BlockSpec((33, 33), resident),     # [w2 | b2]
                pl.BlockSpec((2, 33), resident),      # [w3 | b3]
            ],
            out_specs=pl.BlockSpec((2, tb), batch_tile),
        ),
        compiler_params=pltpu.CompilerParams(
            # Independent batch tiles -> shard across both TensorCores on v7x.
            dimension_semantics=("parallel",),
        ),
    )(xt, w1f, b1f, w2f, w3f)

    return jnp.transpose(out_t)                           # (B, 2)


def init_params(key):
    """Torch-layout params (w: (out,in), b: (out,1)), nn.Linear default init."""
    ks = jax.random.split(key, 6)

    def lin(kw, kb, fan_in, fan_out):
        bound = 1.0 / jnp.sqrt(jnp.float32(fan_in))
        w = jax.random.uniform(kw, (fan_out, fan_in), jnp.float32, -bound, bound)
        b = jax.random.uniform(kb, (fan_out, 1), jnp.float32, -bound, bound)
        return w, b

    w1, b1 = lin(ks[0], ks[1], 8, 32)
    w2, b2 = lin(ks[2], ks[3], 32, 32)
    w3, b3 = lin(ks[4], ks[5], 32, 2)
    return {"w1": w1, "b1": b1, "w2": w2, "b2": b2, "w3": w3, "b3": b3}


def gaussnet_ref(x, p):
    h1 = jnp.maximum(x @ p["w1"].T + p["b1"].T, 0.0)
    h2 = jnp.maximum(h1 @ p["w2"].T + p["b2"].T, 0.0)
    return h2 @ p["w3"].T + p["b3"].T


if __name__ == "__main__":
    key = jax.random.PRNGKey(0)
    k_params, k_x, k_x2 = jax.random.split(key, 3)

    params = init_params(k_params)

    # Small demo batch (batch=8, in_features=8) — single ragged block.
    x = jax.random.normal(k_x, (8, 8), jnp.float32)
    out = jax.block_until_ready(gaussnet_forward(x, params))
    ref = gaussnet_ref(x, params)
    assert out.shape == (8, 2)
    assert jnp.allclose(out, ref, atol=1e-4, rtol=1e-4)

    # Non-multiple batch exercising the multi-step grid + ragged trailing block.
    x2 = jax.random.normal(k_x2, (1000, 8), jnp.float32)
    out2 = jax.block_until_ready(gaussnet_forward(x2, params))
    ref2 = gaussnet_ref(x2, params)
    assert out2.shape == (1000, 2)
    assert jnp.allclose(out2, ref2, atol=1e-4, rtol=1e-4)

    print("KERNEL_OK")
</pallas_src>

<mosaic_0001>
module attributes {stable_mosaic.version = 11 : i64} {
  func.func @gaussnet_kernel(%arg0: i32, %arg1: memref<8x128xf32, #tpu.memory_space<vmem>>, %arg2: memref<33x8xf32, #tpu.memory_space<vmem>>, %arg3: memref<33x1xf32, #tpu.memory_space<vmem>>, %arg4: memref<33x33xf32, #tpu.memory_space<vmem>>, %arg5: memref<2x33xf32, #tpu.memory_space<vmem>>, %arg6: memref<2x128xf32, #tpu.memory_space<vmem>>) attributes {dimension_semantics = [#tpu.dimension_semantics<parallel>], iteration_bounds = array<i64: 1>, scalar_prefetch = 0 : i64, scratch_operands = 0 : i64, tpu.core_type = #tpu.core_type<tc>, window_params = [{transform_indices = @transform_0, window_bounds = array<i64: 8, 128>}, {pipeline_mode = #tpu.pipeline_mode<synchronous>, transform_indices = @transform_1, window_bounds = array<i64: 33, 8>}, {pipeline_mode = #tpu.pipeline_mode<synchronous>, transform_indices = @transform_2, window_bounds = array<i64: 33, 1>}, {pipeline_mode = #tpu.pipeline_mode<synchronous>, transform_indices = @transform_3, window_bounds = array<i64: 33, 33>}, {pipeline_mode = #tpu.pipeline_mode<synchronous>, transform_indices = @transform_4, window_bounds = array<i64: 2, 33>}, {transform_indices = @transform_5, window_bounds = array<i64: 2, 128>}]} {
    %c0 = arith.constant 0 : index
    %c0_0 = arith.constant 0 : index
    %0 = vector.load %arg2[%c0, %c0_0] : memref<33x8xf32, #tpu.memory_space<vmem>>, vector<33x8xf32>
    %c0_1 = arith.constant 0 : index
    %c0_2 = arith.constant 0 : index
    %1 = vector.load %arg3[%c0_1, %c0_2] : memref<33x1xf32, #tpu.memory_space<vmem>>, vector<33x1xf32>
    %c0_3 = arith.constant 0 : index
    %c0_4 = arith.constant 0 : index
    %2 = vector.load %arg4[%c0_3, %c0_4] : memref<33x33xf32, #tpu.memory_space<vmem>>, vector<33x33xf32>
    %c0_5 = arith.constant 0 : index
    %c0_6 = arith.constant 0 : index
    %3 = vector.load %arg5[%c0_5, %c0_6] : memref<2x33xf32, #tpu.memory_space<vmem>>, vector<2x33xf32>
    %c0_i32 = arith.constant 0 : i32
    %c128_i32 = arith.constant 128 : i32
    %4 = arith.muli %c0_i32, %c128_i32 : i32
    %5 = tpu.assume_multiple %4, 128 : i32
    %c0_7 = arith.constant 0 : index
    %6 = arith.index_cast %5 : i32 to index
    %7 = vector.load %arg1[%c0_7, %6] : memref<8x128xf32, #tpu.memory_space<vmem>>, vector<8x128xf32>
    %cst = arith.constant dense<0.000000e+00> : vector<33x128xf32>
    %8 = tpu.matmul %0, %7, %cst {dimension_numbers = #tpu.dot_dimension_numbers<[1], [0], [0], [1], [0, 0, 1, 1], [], []>} : vector<33x8xf32>, vector<8x128xf32>, vector<33x128xf32> -> vector<33x128xf32>
    %9 = vector.broadcast %1 : vector<33x1xf32> to vector<33x128xf32>
    %10 = arith.addf %8, %9 : vector<33x128xf32>
    %cst_8 = arith.constant 0.000000e+00 : f32
    %11 = vector.broadcast %cst_8 : f32 to vector<33x128xf32>
    %12 = arith.maximumf %10, %11 : vector<33x128xf32>
    %cst_9 = arith.constant dense<0.000000e+00> : vector<33x128xf32>
    %13 = tpu.matmul %2, %12, %cst_9 {dimension_numbers = #tpu.dot_dimension_numbers<[1], [0], [0], [1], [0, 0, 1, 1], [], []>} : vector<33x33xf32>, vector<33x128xf32>, vector<33x128xf32> -> vector<33x128xf32>
    %cst_10 = arith.constant 0.000000e+00 : f32
    %14 = vector.broadcast %cst_10 : f32 to vector<33x128xf32>
    %15 = arith.maximumf %13, %14 : vector<33x128xf32>
    %cst_11 = arith.constant dense<0.000000e+00> : vector<2x128xf32>
    %16 = tpu.matmul %3, %15, %cst_11 {dimension_numbers = #tpu.dot_dimension_numbers<[1], [0], [0], [1], [0, 0, 1, 1], [], []>} : vector<2x33xf32>, vector<33x128xf32>, vector<2x128xf32> -> vector<2x128xf32>
    %c0_12 = arith.constant 0 : index
    %17 = arith.index_cast %5 : i32 to index
    %18 = vector.load %arg6[%c0_12, %17] : memref<2x128xf32, #tpu.memory_space<vmem>>, vector<2x128xf32>
    tpu.vector_store %arg6[%c0_12, %17], %16 {strides = array<i32>} : memref<2x128xf32, #tpu.memory_space<vmem>>, vector<2x128xf32>,
    %c1_i32 = arith.constant 1 : i32
    return
  }
  func.func @transform_0(%arg0: i32) -> (i32, i32) {
    %c0_i32 = arith.constant 0 : i32
    %c0_i32_0 = arith.constant 0 : i32
    return %c0_i32, %arg0 : i32, i32
  }
  func.func @transform_1(%arg0: i32) -> (i32, i32) {
    %c0_i32 = arith.constant 0 : i32
    %c0_i32_0 = arith.constant 0 : i32
    %c0_i32_1 = arith.constant 0 : i32
    return %c0_i32, %c0_i32_0 : i32, i32
  }
  func.func @transform_2(%arg0: i32) -> (i32, i32) {
    %c0_i32 = arith.constant 0 : i32
    %c0_i32_0 = arith.constant 0 : i32
    %c0_i32_1 = arith.constant 0 : i32
    return %c0_i32, %c0_i32_0 : i32, i32
  }
  func.func @transform_3(%arg0: i32) -> (i32, i32) {
    %c0_i32 = arith.constant 0 : i32
    %c0_i32_0 = arith.constant 0 : i32
    %c0_i32_1 = arith.constant 0 : i32
    return %c0_i32, %c0_i32_0 : i32, i32
  }
  func.func @transform_4(%arg0: i32) -> (i32, i32) {
    %c0_i32 = arith.constant 0 : i32
    %c0_i32_0 = arith.constant 0 : i32
    %c0_i32_1 = arith.constant 0 : i32
    return %c0_i32, %c0_i32_0 : i32, i32
  }
  func.func @transform_5(%arg0: i32) -> (i32, i32) {
    %c0_i32 = arith.constant 0 : i32
    %c0_i32_0 = arith.constant 0 : i32
    return %c0_i32, %arg0 : i32, i32
  }
}

</mosaic_0001>

<bundles_post_ra>
// kernel: gaussnet_forward.1
= control target key start
LH: loop header
LB: loop body
LE: loop exit
PB: predicated region body
PF: predicated region fallthrough
CT: control target
= control target key end

     0   :  { %vm63_vm0 = vcmask 64512   ;;  %v513_v2 = vmov 0.0   ;;  %vm514_vm1 = vmmov 0   ;;  %v515_v3 = vmov 0   ;;  %s649_s0 = inlined_call_operand.vmem [shape: f32[8,8], index: 0, kind: input, shape index: {}]   ;;  %s650_s1 = inlined_call_operand.vmem [shape: f32[33,8], index: 1, kind: input, shape index: {}]   ;;  %s651_s2 = inlined_call_operand.vmem [shape: f32[33,1], index: 2, kind: input, shape index: {}]   ;;  %s652_s3 = inlined_call_operand.vmem [shape: f32[33,33], index: 3, kind: input, shape index: {}]   ;;  %s653_s4 = inlined_call_operand.vmem [shape: f32[2,33], index: 4, kind: input, shape index: {}]   ;;  %s654_s5 = inlined_call_operand.hbm [shape: f32[2,8], index: 5, kind: output, shape index: {}]  }
   0x1   :  { %v37_v0 = vld [vmem:[%s649_s0] sm:$0xff]  ;;  %415 = vmatprep.subr.mxu0 %v513_v2  ;;  %417 = vmatprep.mubr.msk.f32.mxu0 %vm514_vm1, %v513_v2  ;;  %v28_v5 = vld [vmem:[%s651_s2 + $0x10] sm:$0xff] }
   0x2   :  { %v21_v1 = vld [vmem:[%s650_s1] sm:$0xff]  ;;  %416 = vmatpush3.msra.mxu0 %v37_v0  ;;  %487 = vset.pattern.permute.xlu0 %v515_v3 }
   0x3   :  { %v26_v4 = vld [vmem:[%s651_s2] sm:$0xff]  ;;  %418 = vmatmul.mubr.msk.f32.vlgmr.msra.gmra.mrb[0].mxu0 %vm63_vm0, %v21_v1 }
   0x4   :  { %40 = vperm.xlu0 %487, %v26_v4  }
   0x5   :  { %10 = vsyncpa [#allocation3], 0  ;;  %420 = vmatprep.mubr.msk.f32.mxu0 %vm514_vm1, %v513_v2  ;;  %v22_v6 = vld [vmem:[%s650_s1 + $0x8] sm:$0xff]  ;;  %488 = vset.pattern.permute.xlu1 %v515_v3  ;;  %v29_v8 = vld [vmem:[%s651_s2 + $0x18] sm:$0xff]  ;;  %v516_v13 = vmov 0.0|0.0   ;;  %vm190_vm2 = vcmask 1040384  }
   0x6   :  { %v27_v7 = vld [vmem:[%s651_s2 + $0x8] sm:$0xff]  ;;  %50 = vperm.xlu1 %488, %v28_v5   ;;  %442 = vmatprep.mubr.msk.f32.mxu1 %vm514_vm1, %v513_v2  ;;  %v23_v9 = vld [vmem:[%s650_s1 + $0x10] sm:$0xff]  ;;  %v30_v10 = vld [vmem:[%s651_s2 + $0x20] sm:$0x1]  ;;  %vm174_vm3 = vcmask 269312   ;;  %s517_s23 = smov [#allocation2]  }
   0x7   :  { %421 = vmatmul.mubr.msk.f32.gmra.mrb[2].mxu0 %vm63_vm0, %v22_v6  ;;  %v24_v11 = vld [vmem:[%s650_s1 + $0x18] sm:$0xff]  ;;  %v25_v12 = vld [vmem:[%s650_s1 + $0x20] sm:$0x1]  ;;  %470 = vmatprep.subr.bf16.mxu1 %v516_v13  ;;  %v32_v42 = vld [vmem:[%s652_s3 + $0x8] sm:$0xff]  ;;  %s372_s0 = sshll.u32 %s517_s23, 4  ;;  %s373_s0 = int_to_ptr.vmem [resolvable:$true] %s372_s0 }
   0x8   :  { %45 = vperm.xlu0 %487, %v27_v7   ;;  %423 = vmatprep.mubr.msk.f32.mxu0 %vm514_vm1, %v513_v2  ;;  %v31_v41 = vld [vmem:[%s652_s3] sm:$0xff]  ;;  %v33_v43 = vld [vmem:[%s652_s3 + $0x10] sm:$0xff]  ;;  %v34_v44 = vld [vmem:[%s652_s3 + $0x18] sm:$0xff]  ;;  %s489_s24 = scalar_lea.vmem %s373_s0, 32  ;;  %p494_p1 = scmp.lt.s32.totalorder %s373_s0, %s373_s0 }
   0x9   :  { %476 = vmatprep.subr.bf16.mxu0 %v516_v13  ;;  %v35_v45 = vld [vmem:[%s652_s3 + $0x20] sm:$0x1]  ;;  %p490_p0 = scmp.ne.s32.totalorder %s373_s0, %s489_s24  ;;  %p495_p2 = scmp.lt.s32.totalorder %s489_s24, %s489_s24 }
   0xa   :  { %55 = vperm.xlu1 %488, %v29_v8   ;;  %v36_v63 = vld [vmem:[%s653_s4] sm:$0x3] }
   0xb   :  { %424 = vmatmul.mubr.msk.f32.gmra.mrb[4].mxu0 %vm63_vm0, %v23_v9  ;;  %p496_p3 = por %p495_p2, %p494_p1 }
   0xc   :  { %60 = vperm.xlu0 %487, %v30_v10   ;;  %426 = vmatprep.mubr.msk.f32.mxu0 %vm514_vm1, %v513_v2 }
   0xd   :  { %p497_p4 = pnand %p496_p3, %p490_p0 }
   0xf   :  { %427 = vmatmul.mubr.msk.f32.gmra.mrb[6].mxu0 %vm63_vm0, %v24_v11 }
  0x10   :  { %429 = vmatprep.mubr.msk.f32.mxu0 %vm514_vm1, %v513_v2 }
  0x13   :  { %430 = vmatmul.mubr.msk.f32.gmra.mrb[8].mxu0 %vm63_vm0, %v25_v12 }
  0x14   :  { %467 = vmatprep.mubr.msk.f32.mxu0 %vm514_vm1, %v513_v2 }
  0x83   :  { %v41_v14 = vpop.permute.xlu0 %40 }
  0x85   :  { %v51_v22 = vpop.permute.xlu1 %50 }
  0x87   :  { %v46_v18 = vpop.permute.xlu0 %45 }
  0x89   :  { %v56_v29 = vpop.permute.xlu1 %55 }
  0x8b   :  { %v61_v35 = vpop.permute.xlu0 %60 }
  0xd6   :  { %v145_v15 = vpop.f32.mrb[0].mxu0 }
  0xd7   :  { %v419_v16 = vpop.f32.mrb[1].mxu0  ;;  %v146_v17 = vadd.f32 %v145_v15, %v41_v14 }
  0xd9   :  { %v169_v23 = vmax.f32 %v146_v17, 0.0 }
  0xda   :  { %v150_v19 = vpop.f32.mrb[2].mxu0 }
  0xdb   :  { %v151_v20 = vadd.f32 %v150_v19, %v46_v18  ;;  %v422_v21 = vpop.f32.mrb[3].mxu0 }
  0xdd   :  { %v170_v24 = vmax.f32 %v151_v20, 0.0 }
  0xde   :  { %v155_v25 = vpop.f32.mrb[4].mxu0 }
  0xdf   :  { %v425_v26 = vpop.f32.mrb[5].mxu0  ;;  %v471_v27 = vpack.c.bf16 %v170_v24, %v169_v23  ;;  %v156_v28 = vadd.f32 %v155_v25, %v51_v22 }
  0xe1   :  { %472 = vmatpush3.bf16.msra.mxu1 %v471_v27  ;;  %v171_v33 = vmax.f32 %v156_v28, 0.0 }
  0xe2   :  { %v160_v30 = vpop.f32.mrb[6].mxu0  ;;  %473 = vmatprep.subr.bf16.mxu1 %v516_v13 }
  0xe3   :  { %v161_v31 = vadd.f32 %v160_v30, %v56_v29  ;;  %v428_v32 = vpop.f32.mrb[7].mxu0 }
  0xe5   :  { %v172_v34 = vmax.f32 %v161_v31, 0.0 }
  0xe6   :  { %v165_v36 = vpop.f32.mrb[8].mxu0 }
  0xe7   :  { %v474_v37 = vpack.c.bf16 %v172_v34, %v171_v33  ;;  %v166_v38 = vadd.f32 %v165_v36, %v61_v35  ;;  %v431_v39 = vpop.f32.mrb[9].mxu0 }
  0xe9   :  { %475 = vmatpush3.bf16.msra.mxu1 %v474_v37  ;;  %v173_v40 = vmax.f32 %v166_v38, 0.0 }
  0xea   :  { %440 = vmatprep.subr.mxu1 %v513_v2 }
  0xed   :  { %441 = vmatpush3.msk.msra.mxu1 %vm190_vm2, %v173_v40 }
  0xee   :  { %443 = vmatmul.mubr.msk.f32.vlgmr.msra.gmra.mrb[0].mxu1 %vm174_vm3, %v31_v41 }
  0xef   :  { %445 = vmatprep.mubr.msk.f32.mxu1 %vm514_vm1, %v513_v2 }
  0xf2   :  { %446 = vmatmul.mubr.msk.f32.gmra.mrb[2].mxu1 %vm174_vm3, %v32_v42 }
  0xf3   :  { %448 = vmatprep.mubr.msk.f32.mxu1 %vm514_vm1, %v513_v2 }
  0xf6   :  { %449 = vmatmul.mubr.msk.f32.gmra.mrb[4].mxu1 %vm174_vm3, %v33_v43 }
  0xf7   :  { %451 = vmatprep.mubr.msk.f32.mxu1 %vm514_vm1, %v513_v2 }
  0xfa   :  { %452 = vmatmul.mubr.msk.f32.gmra.mrb[6].mxu1 %vm174_vm3, %v34_v44 }
  0xfb   :  { %454 = vmatprep.mubr.msk.f32.mxu1 %vm514_vm1, %v513_v2 }
  0xfe   :  { %455 = vmatmul.mubr.msk.f32.gmra.mrb[8].mxu1 %vm174_vm3, %v35_v45 }
 0x1c1   :  { %v260_v46 = vpop.f32.mrb[0].mxu1 }
 0x1c2   :  { %v444_v47 = vpop.f32.mrb[1].mxu1  ;;  %v284_v49 = vmax.f32 %v260_v46, 0.0 }
 0x1c5   :  { %v265_v48 = vpop.f32.mrb[2].mxu1 }
 0x1c6   :  { %v285_v50 = vmax.f32 %v265_v48, 0.0  ;;  %v447_v51 = vpop.f32.mrb[3].mxu1 }
 0x1c8   :  { %v477_v52 = vpack.c.bf16 %v285_v50, %v284_v49 }
 0x1c9   :  { %v270_v53 = vpop.f32.mrb[4].mxu1 }
 0x1ca   :  { %v450_v54 = vpop.f32.mrb[5].mxu1  ;;  %478 = vmatpush3.bf16.msra.mxu0 %v477_v52  ;;  %v286_v56 = vmax.f32 %v270_v53, 0.0 }
 0x1cb   :  { %479 = vmatprep.subr.bf16.mxu0 %v516_v13 }
 0x1cd   :  { %v275_v55 = vpop.f32.mrb[6].mxu1 }
 0x1ce   :  { %v287_v57 = vmax.f32 %v275_v55, 0.0  ;;  %v453_v58 = vpop.f32.mrb[7].mxu1 }
 0x1d0   :  { %v480_v59 = vpack.c.bf16 %v287_v57, %v286_v56 }
 0x1d1   :  { %v280_v60 = vpop.f32.mrb[8].mxu1 }
 0x1d2   :  { %481 = vmatpush3.bf16.msra.mxu0 %v480_v59  ;;  %v288_v61 = vmax.f32 %v280_v60, 0.0  ;;  %v456_v62 = vpop.f32.mrb[9].mxu1 }
 0x1d3   :  { %465 = vmatprep.subr.mxu0 %v513_v2 }
 0x1d6   :  { %466 = vmatpush3.msk.msra.mxu0 %vm190_vm2, %v288_v61 }
 0x1d7   :  { %468 = vmatmul.mubr.msk.f32.vlgmr.msra.gmra.mrb[10].mxu0 %vm174_vm3, %v36_v63 }
 0x2aa   :  { %v361_v0 = vpop.f32.mrb[10].mxu0 }
 0x2ab   :  { %365 = vst [vmem:[#allocation2] sm:$0x3] %v361_v0  ;;  %v469_v1 = vpop.f32.mrb[11].mxu0 }
 0x2ac   :  { %500 = shalt.err (!%p497_p4)
}
 0x2ad   :  { %s501_s4 = scalar_lea.hbm %s654_s5, 32 }
 0x2ae   :  { %p502_p5 = scmp.ne.s32.totalorder %s654_s5, %s501_s4  ;;  %p505_p6 = scmp.lt.u32.totalorder %s501_s4, %s654_s5 }
 0x2b0   :  { %p507_p7 = pnand %p505_p6, %p502_p5 }
 0x2b2   :  { %510 = shalt.err (!%p507_p7)
}
 0x2b3   :  { %375 = dma.vmem_to_hbm [thread:$0]  %s373_s0, 32, %s654_s5, [#allocation3]  }
 0x2b4   :  { %511 = dma.done.wait [#allocation3], 32  }
 0x2b5   :  { %512 = vsyncadd [#allocation3], 4294967264 }
 0x2b6   :  { %379 = vsyncpa [#allocation3], 1 }

</bundles_post_ra>
